<compile_context>
chip_gen: v6e
topology: v6e:2x2x1
jax: 0.10.0
libtpu: 0.0.40
codegen_flags: <defaults>
</compile_context>

<pallas_src>
import functools

import jax
import jax.numpy as jnp
from jax.experimental import pallas as pl
from jax.experimental.pallas import tpu as pltpu


def _round_up(x: int, m: int) -> int:
    return ((x + m - 1) // m) * m


def _vmem_capacity_bytes() -> int:
    """Physical VMEM per TensorCore; conservative (v7x) fallback if unknown."""
    try:
        return int(pltpu.get_tpu_info().vmem_capacity_bytes)
    except Exception:
        return 64 * 1024 * 1024


def _pick_block(total: int, cap: int, quantum: int):
    """Pick a block size for one dim, avoiding padding when possible.

    Returns (block, padded_total). Prefers the full dim (exempt from the
    (8,128) divisibility rule) or a quantum-multiple that divides `total`;
    only pads as a last resort.
    """
    if total <= cap:
        return total, total
    t = (cap // quantum) * quantum
    while t >= quantum:
        if total % t == 0:
            return t, total
        t -= quantum
    blk = max(quantum, (cap // quantum) * quantum)
    return blk, _round_up(total, blk)


def _linear_kernel_tiled(x_ref, w_ref, b_ref, o_ref):
    """One (tm, tn) output tile; K (input_dim) is the last grid axis.

    The f32 output block is the accumulator: bias + first partial product at
    k == 0, '+=' for the remaining K steps. No scratch, no finalize copy.
    """
    k = pl.program_id(2)
    part = jnp.dot(x_ref[...], w_ref[...], preferred_element_type=jnp.float32)

    @pl.when(k == 0)
    def _():
        o_ref[...] = (part + b_ref[...]).astype(o_ref.dtype)

    @pl.when(k > 0)
    def _():
        o_ref[...] += part.astype(o_ref.dtype)


def _linear_kernel_single(x_ref, w_ref, b_ref, o_ref):
    """Single-block fast path: whole problem in one VMEM block."""
    o_ref[...] = (
        jnp.dot(x_ref[...], w_ref[...], preferred_element_type=jnp.float32)
        + b_ref[...]
    ).astype(o_ref.dtype)


@functools.partial(jax.jit, static_argnames=("compute_dtype",))
def linear_probe_forward(x, weight, bias, *, compute_dtype=jnp.float32):
    """Equivalent of LinearProbe.forward: y = x @ weight.T + bias.

    Args:
      x:      (B, D) float32
      weight: (O, D) float32  — PyTorch nn.Linear weight layout
      bias:   (O,)   float32
      compute_dtype: dtype used to feed the MXU (float32 default; bfloat16
        halves HBM traffic, accumulation stays float32).
    Returns:
      (B, O) array in x.dtype.
    """
    B, D = x.shape
    O = weight.shape[0]
    dsize = jnp.dtype(compute_dtype).itemsize

    # ---- generation-aware VMEM budget (v7x: 64 MiB, v5e/v6e: 128 MiB) ------
    vmem = _vmem_capacity_bytes()
    budget = min(int(0.6 * vmem), 96 * 1024 * 1024)
    vmem_limit = min(int(0.75 * vmem), 112 * 1024 * 1024)

    # ---- output dim is the ONLY padded dim (lane-dense output stores) ------
    Op = _round_up(O, 128)
    if Op <= 512:
        tn = Op                                    # grid_N == 1: x read once
    else:
        tn, Op = _pick_block(Op, 512, 128)

    # tm: divisor of B (or full B) up to 512 sublane-aligned rows — no B pad.
    tm, Bp = _pick_block(B, 512, 8)

    # tk: as large as the double-buffered footprint allows; divisor of D (or
    # full D) so x is not padded along the reduction dim.
    fixed = 2 * 4 * tm * tn + 2 * 4 * tn           # out + bias blocks (f32)
    tk_cap = max(128, (budget - fixed) // (2 * dsize * (tm + tn)))
    tk, Dp = _pick_block(D, tk_cap, 128)

    gM, gN, gK = Bp // tm, Op // tn, Dp // tk

    # v7x has 2 TensorCores fed by parallel grid axes: expose >= 2 M blocks
    # when the grid would otherwise have a single parallel block.
    if gM == 1 and gN == 1 and B >= 16 and B % 16 == 0:
        tm = B // 2
        gM = 2

    # ---- operand prep: weight transposed once, only O padded ---------------
    x_c = x.astype(compute_dtype)
    if Bp != B or Dp != D:                         # rare fallback path only
        x_c = jnp.pad(x_c, ((0, Bp - B), (0, Dp - D)))
    w_c = weight.T.astype(compute_dtype)           # (D, O): plain dot in-kernel
    if Dp != D or Op != O:
        w_c = jnp.pad(w_c, ((0, Dp - D), (0, Op - O)))
    b_p = bias.astype(jnp.float32)
    if Op != O:
        b_p = jnp.pad(b_p, (0, Op - O))
    b_p = b_p.reshape(1, Op)

    cost = pl.CostEstimate(
        flops=2 * Bp * Dp * Op,
        transcendentals=0,
        bytes_accessed=dsize * (Bp * Dp + Dp * Op) + 4 * (Bp * Op + Op),
    )

    if (gM, gN, gK) == (1, 1, 1):
        # Single-block fast path: no grid, no pipeline warm-up, no scratch.
        out_p = pl.pallas_call(
            _linear_kernel_single,
            out_shape=jax.ShapeDtypeStruct((Bp, Op), jnp.float32),
            compiler_params=pltpu.CompilerParams(vmem_limit_bytes=vmem_limit),
            cost_estimate=cost,
        )(x_c, w_c, b_p)
    else:
        out_p = pl.pallas_call(
            _linear_kernel_tiled,
            out_shape=jax.ShapeDtypeStruct((Bp, Op), jnp.float32),
            grid_spec=pltpu.PrefetchScalarGridSpec(
                num_scalar_prefetch=0,
                grid=(gM, gN, gK),
                in_specs=[
                    pl.BlockSpec((tm, tk), lambda i, j, k: (i, k)),   # x tile
                    pl.BlockSpec((tk, tn), lambda i, j, k: (k, j)),   # W.T tile (D, O)
                    pl.BlockSpec((1, tn), lambda i, j, k: (0, j)),    # bias tile
                ],
                out_specs=pl.BlockSpec((tm, tn), lambda i, j, k: (i, j)),
            ),
            compiler_params=pltpu.CompilerParams(
                dimension_semantics=("parallel", "parallel", "arbitrary"),
                vmem_limit_bytes=vmem_limit,
            ),
            cost_estimate=cost,
        )(x_c, w_c, b_p)

    out = out_p
    if Bp != B or Op != O:
        out = out[:B, :O]
    return out.astype(x.dtype)


if __name__ == "__main__":
    # True LinearProbe shapes: LinearProbe(input_dim=32, output_dim=1), batch=8.
    batch, input_dim, output_dim = 8, 32, 1
    key = jax.random.PRNGKey(0)
    kx, kw, kb = jax.random.split(key, 3)

    x = jax.random.normal(kx, (batch, input_dim), dtype=jnp.float32)
    bound = 1.0 / (input_dim ** 0.5)  # PyTorch default init bound = 1/sqrt(fan_in)
    weight = jax.random.uniform(kw, (output_dim, input_dim), jnp.float32, -bound, bound)
    bias = jax.random.uniform(kb, (output_dim,), jnp.float32, -bound, bound)

    y = linear_probe_forward(x, weight, bias)         # single-block fast path
    jax.block_until_ready(y)
    y_ref = x @ weight.T + bias
    assert y.shape == (batch, output_dim)
    assert jnp.allclose(y, y_ref, atol=1e-5, rtol=1e-5)

    # Larger shape exercising the tiled multi-block path (grid = (2, 1, 1)).
    B2, D2, O2 = 512, 1024, 256
    k1, k2, k3 = jax.random.split(jax.random.PRNGKey(1), 3)
    x2 = jax.random.normal(k1, (B2, D2), jnp.float32)
    w2 = jax.random.normal(k2, (O2, D2), jnp.float32) * 0.02
    b2 = jax.random.normal(k3, (O2,), jnp.float32)
    y2 = linear_probe_forward(x2, w2, b2)
    jax.block_until_ready(y2)
    y2_ref = x2 @ w2.T + b2
    assert jnp.allclose(y2, y2_ref, atol=1e-3, rtol=1e-3)

    # Optional bf16-compute path (halved HBM traffic, native MXU rate).
    y3 = linear_probe_forward(x2, w2, b2, compute_dtype=jnp.bfloat16)
    jax.block_until_ready(y3)
    assert jnp.allclose(y3, y2_ref, atol=5e-2, rtol=5e-2)

    print("KERNEL_OK")
</pallas_src>

<mosaic_0001>
module attributes {stable_mosaic.version = 11 : i64} {
  func.func @_linear_kernel_single(%arg0: memref<8x32xf32, #tpu.memory_space<vmem>>, %arg1: memref<32x128xf32, #tpu.memory_space<vmem>>, %arg2: memref<1x128xf32, #tpu.memory_space<vmem>>, %arg3: memref<8x128xf32, #tpu.memory_space<vmem>>) attributes {dimension_semantics = [], scalar_prefetch = 0 : i64, scratch_operands = 0 : i64, tpu.core_type = #tpu.core_type<tc>} {
    %c0 = arith.constant 0 : index
    %c0_0 = arith.constant 0 : index
    %0 = vector.load %arg0[%c0, %c0_0] : memref<8x32xf32, #tpu.memory_space<vmem>>, vector<8x32xf32>
    %c0_1 = arith.constant 0 : index
    %c0_2 = arith.constant 0 : index
    %1 = vector.load %arg1[%c0_1, %c0_2] : memref<32x128xf32, #tpu.memory_space<vmem>>, vector<32x128xf32>
    %cst = arith.constant dense<0.000000e+00> : vector<8x128xf32>
    %2 = tpu.matmul %0, %1, %cst {dimension_numbers = #tpu.dot_dimension_numbers<[1], [0], [0], [1], [0, 0, 1, 1], [], []>} : vector<8x32xf32>, vector<32x128xf32>, vector<8x128xf32> -> vector<8x128xf32>
    %c0_3 = arith.constant 0 : index
    %c0_4 = arith.constant 0 : index
    %3 = vector.load %arg2[%c0_3, %c0_4] : memref<1x128xf32, #tpu.memory_space<vmem>>, vector<1x128xf32>
    %4 = vector.broadcast %3 : vector<1x128xf32> to vector<8x128xf32>
    %5 = arith.addf %2, %4 : vector<8x128xf32>
    %c0_5 = arith.constant 0 : index
    %c0_6 = arith.constant 0 : index
    %6 = vector.load %arg3[%c0_5, %c0_6] : memref<8x128xf32, #tpu.memory_space<vmem>>, vector<8x128xf32>
    tpu.vector_store %arg3[%c0_5, %c0_6], %5 {strides = array<i32>} : memref<8x128xf32, #tpu.memory_space<vmem>>, vector<8x128xf32>,
    return
  }
}

</mosaic_0001>

<bundles_post_ra>
// kernel: linear_probe_forward.1
= control target key start
LH: loop header
LB: loop body
LE: loop exit
PB: predicated region body
PF: predicated region fallthrough
CT: control target
= control target key end

     0   :  { %v125_v0 = vmov 0.0   ;;  %vm126_vm0 = vmmov 0   ;;  %vm26_vm1 = vcmask 261120   ;;  %s168_s1 = inlined_call_operand.vmem [shape: f32[32,128], index: 1, kind: input, shape index: {}]   ;;  %s169_s0 = inlined_call_operand.vmem [shape: f32[8,32], index: 0, kind: input, shape index: {}]   ;;  %s170_s2 = inlined_call_operand.vmem [shape: f32[1,128], index: 2, kind: input, shape index: {}]   ;;  %s171_s3 = inlined_call_operand.vmem [shape: f32[8,128], index: 3, kind: output, shape index: {}]  }
   0x1   :  { %112 = vmatprep.subr.mxu0 %v125_v0  ;;  %v18_v1 = vld [vmem:[%s168_s1 + $0x18] sm:$0xff]  ;;  %v17_v2 = vld [vmem:[%s168_s1 + $0x10] sm:$0xff]  ;;  %120 = vmatprep.mubr.msk.f32.mxu0 %vm126_vm0, %v125_v0  ;;  %v16_v3 = vld [vmem:[%s168_s1 + $0x8] sm:$0xff] }
   0x2   :  { %113 = vmatpush3.msra.mxu0 %v18_v1  ;;  %v15_v4 = vld [vmem:[%s168_s1] sm:$0xff] }
   0x3   :  { %114 = vmatprep.subr.mxu0 %v125_v0  ;;  %v14_v5 = vld [vmem:[%s169_s0] sm:$0xff] }
   0x4   :  { %115 = vmatpush3.msra.mxu0 %v17_v2  ;;  %v105_v6 = vld [vmem:[%s170_s2] ss:$0 sm:$0xff] }
   0x5   :  { %116 = vmatprep.subr.mxu0 %v125_v0 }
   0x6   :  { %117 = vmatpush3.msra.mxu0 %v16_v3 }
   0x7   :  { %118 = vmatprep.subr.mxu0 %v125_v0 }
   0x8   :  { %119 = vmatpush3.msra.mxu0 %v15_v4 }
   0x9   :  { %121 = vmatmul.mubr.msk.f32.vlgmr.msra.gmra.mxu0 %vm26_vm1, %v14_v5 }
  0xc9   :  { %v96_v7 = vpop.f32.mrf.mxu0 }
  0xca   :  { %v97_v8 = vadd.f32 %v105_v6, %v96_v7 }
  0xcb   :  { %v122_v9 = vpop.f32.mrf.mxu0 }
  0xcc   :  { %100 = vst [vmem:[%s171_s3] sm:$0xff] %v97_v8 }

</bundles_post_ra>
